<compile_context>
chip_gen: v5e
topology: v5e:2x2
jax: 0.10.0
libtpu: 0.0.40
codegen_flags: <defaults>
</compile_context>

<pallas_src>
import jax
import jax.numpy as jnp
from jax.experimental import pallas as pl
from jax.experimental.pallas import tpu as pltpu

HDIM = 128          # lane-padded stand-in for the module's 2048-d features
CENTER = 3          # cfg['center']
GLOBAL_CONST = 0.8
SIGMA_MIN = 0.1     # cfg['min_sigma']
SIGMA_SCALE = 1.0
SCALER = 20.0
KMEANS_ITERS = 10
PATCH = 4


def _round_up(n, m):
    return ((n + m - 1) // m) * m


# ----------------------------------------------------------------------------
# Kernel 1: patch-embed encoder stand-in (matmul + ReLU), row-tiled grid
# ----------------------------------------------------------------------------
def _patch_embed_kernel(x_ref, w_ref, o_ref):
    # TODO(synk): resnet50/101 encoder is not defined in the provided module;
    # replaced by a deterministic patch-embed matmul + ReLU stand-in.
    o_ref[...] = jnp.maximum(
        jnp.dot(x_ref[...], w_ref[...], preferred_element_type=jnp.float32),
        0.0).astype(o_ref.dtype)


def patch_embed(x, w, tm_target=1024):
    # x: (R, Kin) f32, w: (Kin, HDIM) f32 -> (R, HDIM) bf16
    R, kin = x.shape
    kin_p = _round_up(kin, 128)
    if kin_p != kin:
        x = jnp.pad(x, ((0, 0), (0, kin_p - kin)))
        w = jnp.pad(w, ((0, kin_p - kin), (0, 0)))
    # bf16 MXU inputs + bf16 output: kernel is HBM-bandwidth-bound, so the f32
    # output was the single largest stream.
    x = x.astype(jnp.bfloat16)
    w = w.astype(jnp.bfloat16)
    tm = min(_round_up(R, 8), tm_target)
    rp = _round_up(R, tm)
    if rp != R:
        x = jnp.pad(x, ((0, rp - R), (0, 0)))
    out = pl.pallas_call(
        _patch_embed_kernel,
        grid=(rp // tm,),
        in_specs=[pl.BlockSpec((tm, kin_p), lambda i: (i, 0)),
                  pl.BlockSpec((kin_p, HDIM), lambda i: (0, 0))],
        out_specs=pl.BlockSpec((tm, HDIM), lambda i: (i, 0)),
        out_shape=jax.ShapeDtypeStruct((rp, HDIM), jnp.bfloat16),
        compiler_params=pltpu.CompilerParams(
            dimension_semantics=("parallel",)),
    )(x, w)
    return out[:R]


# ----------------------------------------------------------------------------
# Kernel 2: masked average pooling at feature resolution.  The bilinear resize
#           and 1/(sum+1e-5) are folded into the masks in JAX, so each group is
#           a single (2, fhw) x (fhw, C) matmul.  Groups blocked 8 per step.
# ----------------------------------------------------------------------------
def _masked_pool_kernel(f_ref, m_ref, o_ref):
    for g in range(f_ref.shape[0]):                     # static unroll over groups
        f = f_ref[g]                                    # (fhw, C) bf16
        m = m_ref[g].astype(jnp.bfloat16)               # (2, fhw)  [fg; bg]
        o_ref[g] = jax.lax.dot_general(m, f, (((1,), (0,)), ((), ())),
                                       preferred_element_type=jnp.float32)


def masked_pool(fts, masks):
    # fts: (G, fhw, C), masks: (G, 2, fhw) with resize + 1/den already folded in
    G, fhw, C = fts.shape
    gb = min(8, G)
    gp = _round_up(G, gb)
    if gp != G:
        fts = jnp.pad(fts, ((0, gp - G), (0, 0), (0, 0)))
        masks = jnp.pad(masks, ((0, gp - G), (0, 0), (0, 0)))
    fts = fts.astype(jnp.bfloat16)
    out = pl.pallas_call(
        _masked_pool_kernel,
        grid=(gp // gb,),
        in_specs=[pl.BlockSpec((gb, fhw, C), lambda g: (g, 0, 0)),
                  pl.BlockSpec((gb, 2, fhw), lambda g: (g, 0, 0))],
        out_specs=pl.BlockSpec((gb, 2, C), lambda g: (g, 0, 0)),
        out_shape=jax.ShapeDtypeStruct((gp, 2, C), jnp.float32),
        compiler_params=pltpu.CompilerParams(
            dimension_semantics=("parallel",)),
    )(fts, masks)
    return out[:G]


# ----------------------------------------------------------------------------
# Kernel 3: weighted Lloyd k-means, transposed (pixels on the lane axis),
#           batched over clustering problems.
# ----------------------------------------------------------------------------
def _kmeans_kernel(x_ref, w_ref, c0_ref, o_ref):
    # TODO(synk): KmeansClustering (init='random') is an external class;
    # deterministic weighted Lloyd iterations are used as a stand-in.
    # Zero-weight (padding) rows never influence the centroids.
    x = x_ref[...]                                      # (N, C) bf16, VMEM-resident
    w = w_ref[...]                                      # (N, 1) f32
    K = o_ref.shape[0]
    N = x.shape[0]
    xw = x.astype(jnp.float32) * w                      # loop-invariant, hoisted (f32)
    iota_k = jax.lax.broadcasted_iota(jnp.int32, (K, N), 0)

    def body(_, cents):                                 # cents: (K, C) f32
        cb = cents.astype(jnp.bfloat16)
        # squared-distance argmin only needs |c|^2 - 2*x.c (x^2 is per-pixel const)
        c2 = jnp.sum(cents * cents, axis=1, keepdims=True)                    # (K, 1)
        xc = jax.lax.dot_general(cb, x, (((1,), (1,)), ((), ())),
                                 preferred_element_type=jnp.float32)          # (K, N)
        d = c2 - 2.0 * xc                                                     # (K, N)
        mn = jnp.min(d, axis=0, keepdims=True)                                # (1, N)
        amin = jnp.min(jnp.where(d <= mn, iota_k, K), axis=0, keepdims=True)  # (1, N)
        onehot = (iota_k == amin).astype(jnp.float32)                         # (K, N)
        num = jax.lax.dot_general(onehot, xw, (((1,), (0,)), ((), ())),
                                  preferred_element_type=jnp.float32)         # (K, C)
        den = jax.lax.dot_general(onehot, w, (((1,), (0,)), ((), ())),
                                  preferred_element_type=jnp.float32)         # (K, 1)
        new = num / (den + 1e-8)
        return jnp.where(den > 0.0, new, cents)

    o_ref[...] = jax.lax.fori_loop(0, KMEANS_ITERS, body, c0_ref[...])


def kmeans_batched(X, Wt, C0):
    # X: (P, N, C), Wt: (P, N, 1) f32, C0: (P, K, C) f32 -> (P, K, C) f32
    P, N, C = X.shape
    K = C0.shape[1]
    X = X.astype(jnp.bfloat16)          # bf16 distance-matmul operand, halves tile
    return pl.pallas_call(
        _kmeans_kernel,
        grid=(P,),
        in_specs=[pl.BlockSpec((None, N, C), lambda p: (p, 0, 0)),
                  pl.BlockSpec((None, N, 1), lambda p: (p, 0, 0)),
                  pl.BlockSpec((None, K, C), lambda p: (p, 0, 0))],
        out_specs=pl.BlockSpec((None, K, C), lambda p: (p, 0, 0)),
        out_shape=jax.ShapeDtypeStruct((P, K, C), jnp.float32),
        compiler_params=pltpu.CompilerParams(
            dimension_semantics=("parallel",),
            vmem_limit_bytes=32 * 1024 * 1024),
    )(X, Wt, C0)


# ----------------------------------------------------------------------------
# Kernel 4: fused cosine-distance (all classes) + class softmax + prototype
#           selection + decoder stand-in.  Pixels on the lane axis everywhere;
#           prototypes live in KP = round_up(n_cls*CENTER, 8) rows only, and
#           every per-class reduction is a static 3-row slice (no masking).
# ----------------------------------------------------------------------------
def _query_head_kernel(q_ref, p_ref, prob_ref, sig_ref):
    q = q_ref[...]                                      # (tr, C) bf16
    p = p_ref[...]                                      # (KP, C) f32, zero-padded
    n_cls = prob_ref.shape[0]
    C = q.shape[1]
    qf = q.astype(jnp.float32)

    # One small MXU pass covers every prototype of every class (bf16 in, f32 acc).
    dot_t = jax.lax.dot_general(p.astype(jnp.bfloat16), q,
                                (((1,), (1,)), ((), ())),
                                preferred_element_type=jnp.float32)   # (KP, tr)
    pn2 = jnp.sum(p * p, axis=1, keepdims=True)                       # (KP, 1) f32
    qn2 = jax.lax.dot_general(jnp.ones((1, C), jnp.float32), qf * qf,
                              (((1,), (1,)), ((), ())),
                              preferred_element_type=jnp.float32)     # (1, tr) f32
    # torch.cosine_similarity semantics: clamp each norm separately at 1e-8.
    sim_t = (dot_t
             * jax.lax.rsqrt(jnp.maximum(pn2, 1e-16))
             * jax.lax.rsqrt(jnp.maximum(qn2, 1e-16)))                # (KP, tr)

    maxes, dsel = [], []
    for c in range(n_cls):
        lo = c * CENTER
        sc = sim_t[lo:lo + CENTER, :]                   # (CENTER, tr) static slice
        mx = jnp.max(sc, axis=0, keepdims=True)                       # (1, tr)
        maxes.append(mx)
        if c < 2:   # classes 0 (bg) and 1 (first fg way) feed the decoder
            dc = dot_t[lo:lo + CENTER, :]
            rows = jax.lax.broadcasted_iota(jnp.int32, sc.shape, 0)
            kstar = jnp.min(jnp.where(sc >= mx, rows, CENTER), axis=0,
                            keepdims=True)                            # (1, tr)
            # q[r] . p[kstar[r]]  ==  dot_t[lo+kstar[r], r]  (selected prototype)
            dsel.append(jnp.sum(jnp.where(rows == kstar, dc, 0.0),
                                axis=0, keepdims=True))               # (1, tr)

    dist_t = jnp.concatenate(maxes, axis=0) * SCALER                  # (n_cls, tr)
    m = jnp.max(dist_t, axis=0, keepdims=True)
    e = jnp.exp(dist_t - m)
    prob_ref[...] = e / jnp.sum(e, axis=0, keepdims=True)             # softmax (f32)

    # TODO(synk): Decoder is an external class not defined in the module; this
    # per-pixel projection + sigmoid stand-in yields sigma in
    # [SIGMA_MIN, SIGMA_MIN + SIGMA_SCALE].
    z = (dsel[1] - dsel[0]) * (1.0 / jnp.float32(C) ** 0.5)           # (1, tr)
    sig_ref[...] = SIGMA_MIN + SIGMA_SCALE * jax.nn.sigmoid(z)


def query_head(Q, P, n_cls):
    # Q: (B, R, C), P: (B, KP, C) f32 -> prob (B, n_cls, R), sigma (B, 1, R)
    B, R, C = Q.shape
    KP = P.shape[1]
    # With KP=8 the (KP, tr) intermediates stay tiny, so tr=512 is safe.
    tr = 512 if R > 512 else _round_up(R, 8)
    Rp = _round_up(R, tr)
    if Rp != R:
        Q = jnp.pad(Q, ((0, 0), (0, Rp - R), (0, 0)))
    Q = Q.astype(jnp.bfloat16)
    # NOTE: on v7x both grid axes are 'parallel' so (B, Rp//tr) shards across
    # the 2 TensorCores; collapse to one axis if B*Rp//tr ever gets tiny.
    prob, sig = pl.pallas_call(
        _query_head_kernel,
        grid=(B, Rp // tr),
        in_specs=[pl.BlockSpec((None, tr, C), lambda b, r: (b, r, 0)),
                  pl.BlockSpec((None, KP, C), lambda b, r: (b, 0, 0))],
        out_specs=[pl.BlockSpec((None, n_cls, tr), lambda b, r: (b, 0, r)),
                   pl.BlockSpec((None, 1, tr), lambda b, r: (b, 0, r))],
        out_shape=[jax.ShapeDtypeStruct((B, n_cls, Rp), jnp.float32),
                   jax.ShapeDtypeStruct((B, 1, Rp), jnp.float32)],
        compiler_params=pltpu.CompilerParams(
            dimension_semantics=("parallel", "parallel")),
    )(Q, P)
    return prob[..., :R], sig[..., :R]


# ----------------------------------------------------------------------------
# JAX glue: interpolation matrices, feature prep, prototype assembly
# ----------------------------------------------------------------------------
def bilinear_matrix(out_size, in_size):
    """align_corners=True bilinear interpolation matrix (out_size, in_size)."""
    if in_size == 1:
        return jnp.ones((out_size, 1), jnp.float32)
    if out_size == 1:
        m = jnp.zeros((1, in_size), jnp.float32)
        return m.at[0, 0].set(1.0)
    pos = jnp.arange(out_size, dtype=jnp.float32) * (in_size - 1) / (out_size - 1)
    i0 = jnp.clip(jnp.floor(pos).astype(jnp.int32), 0, in_size - 2)
    frac = pos - i0.astype(jnp.float32)
    rows = jnp.arange(out_size)
    m = jnp.zeros((out_size, in_size), jnp.float32)
    m = m.at[rows, i0].add(1.0 - frac)
    m = m.at[rows, i0 + 1].add(frac)
    return m


def nearest_resize_batch(m, h_out, w_out):
    """PyTorch 'nearest' interpolate on the last two dims of m (..., H, W)."""
    H, W = m.shape[-2:]
    ri = (jnp.arange(h_out) * (H / h_out)).astype(jnp.int32)
    ci = (jnp.arange(w_out) * (W / w_out)).astype(jnp.int32)
    return m[..., ri, :][..., :, ci]


def bilinear_resize_batch(x, h_out, w_out):
    """align_corners=True bilinear resize on (..., h, w, C)."""
    h, w = x.shape[-3:-1]
    mh = bilinear_matrix(h_out, h)
    mw = bilinear_matrix(w_out, w)
    return jnp.einsum("Hh,...hwc,Ww->...HWc", mh, x, mw)


def encoder(imgs_nchw, w_patch):
    """Patch-embed encoder stand-in; returns (M, h, w, HDIM) channels-last bf16."""
    M, cin, H, W = imgs_nchw.shape
    p = PATCH
    x = imgs_nchw.reshape(M, cin, H // p, p, W // p, p)
    x = x.transpose(0, 2, 4, 1, 3, 5).reshape(M * (H // p) * (W // p),
                                              cin * p * p)
    fts = patch_embed(x, w_patch)
    return fts.reshape(M, H // p, W // p, HDIM)


def _chunk_init(x, w, n_real, K):
    """Deterministic weighted chunk-mean init for the k-means stand-in."""
    cents = []
    for k in range(K):
        lo = k * n_real // K
        hi = (k + 1) * n_real // K if k < K - 1 else n_real
        xs, ws = x[lo:hi], w[lo:hi]
        cents.append(jnp.sum(xs.astype(jnp.float32) * ws, axis=0)
                     / (jnp.sum(ws) + 1e-8))
    return jnp.stack(cents, axis=0)


def few_shot_seg_forward(supp_imgs, fore_mask, back_mask, qry_imgs, w_patch):
    n_ways = len(supp_imgs)
    n_shots = len(supp_imgs[0])
    n_queries = len(qry_imgs)
    B = supp_imgs[0][0].shape[0]
    H, W = supp_imgs[0][0].shape[-2:]
    n_cls = 1 + n_ways
    KP = _round_up(n_cls * CENTER, 8)

    imgs_concat = jnp.concatenate(
        [jnp.concatenate(way, 0) for way in supp_imgs]
        + [jnp.concatenate(qry_imgs, 0)], 0)
    img_fts = encoder(imgs_concat, w_patch)                  # (M, fh, fw, C) bf16
    fh, fw = img_fts.shape[1:3]

    supp_fts = img_fts[: n_ways * n_shots * B].reshape(
        n_ways, n_shots, B, fh, fw, HDIM)
    qry_fts = img_fts[n_ways * n_shots * B:].reshape(
        n_queries, B, fh, fw, HDIM)

    fore = jnp.stack([jnp.stack(way, 0) for way in fore_mask], 0)  # (Wa,Sh,B,H,W)
    back = jnp.stack([jnp.stack(way, 0) for way in back_mask], 0)

    # ---- masked average pooling at feature resolution ----------------------
    # sum_HW(resize(F)*mask) == sum_hw(F * Mh^T mask Mw): fold the bilinear
    # resize AND the 1/(sum(mask)+1e-5) into the masks; never upsample features.
    G = n_ways * n_shots * B
    supp_flat = supp_fts.reshape(G, fh, fw, HDIM)
    mh_big = bilinear_matrix(H, fh)
    mw_big = bilinear_matrix(W, fw)
    fore_g = fore.reshape(G, H, W)
    back_g = back.reshape(G, H, W)
    den_f = jnp.sum(fore_g, axis=(1, 2)) + 1e-5
    den_b = jnp.sum(back_g, axis=(1, 2)) + 1e-5
    fore_small = jnp.einsum("Hh,gHW,Ww->ghw", mh_big, fore_g, mw_big)
    back_small = jnp.einsum("Hh,gHW,Ww->ghw", mh_big, back_g, mw_big)
    masks01 = jnp.stack([fore_small / den_f[:, None, None],
                         back_small / den_b[:, None, None]],
                        axis=1).reshape(G, 2, fh * fw)          # (G, 2, fhw)
    pooled = masked_pool(supp_flat.reshape(G, fh * fw, HDIM), masks01)  # (G,2,C)
    fg_glo = pooled[:, 0].reshape(n_ways, n_shots, B, HDIM)
    bg_glo = pooled[:, 1].reshape(n_ways, n_shots, B, HDIM)

    # ---- local features / weights for batched k-means ---------------------
    # TODO(synk): torch selects rows with boolean masking (dynamic shape);
    # here every row is kept with a per-row weight, which yields the same
    # weighted k-means statistics (padding rows get weight 0).
    up = 2
    fg_loc = bilinear_resize_batch(supp_flat, fh * up, fw * up).reshape(
        n_ways, n_shots, B, fh * up * fw * up, HDIM)
    fg_w = nearest_resize_batch(fore, fh * up, fw * up).reshape(
        n_ways, n_shots, B, fh * up * fw * up)
    bg_loc = supp_fts.reshape(n_ways, n_shots, B, fh * fw, HDIM)
    bg_w = nearest_resize_batch(back, fh, fw).reshape(
        n_ways, n_shots, B, fh * fw)

    n_fg = n_shots * fh * up * fw * up
    n_bg = n_ways * n_shots * fh * fw
    n_fg_p = _round_up(n_fg, 8)
    n_bg_p = _round_up(n_bg, 8)

    # fg problems (per (episode, way)) and bg problems (per episode) go into
    # two separate kmeans calls so bg is never padded up to the fg size.
    Xf, Wf, Cf = [], [], []
    for epi in range(B):
        for way in range(n_ways):
            x = fg_loc[way, :, epi].reshape(n_fg, HDIM)
            wgt = fg_w[way, :, epi].reshape(n_fg, 1)
            x = jnp.pad(x, ((0, n_fg_p - n_fg), (0, 0)))
            wgt = jnp.pad(wgt, ((0, n_fg_p - n_fg), (0, 0)))
            Xf.append(x)
            Wf.append(wgt)
            Cf.append(_chunk_init(x, wgt, n_fg, CENTER))
    Xb, Wb, Cb = [], [], []
    for epi in range(B):
        x = bg_loc[:, :, epi].reshape(n_bg, HDIM)
        wgt = bg_w[:, :, epi].reshape(n_bg, 1)
        x = jnp.pad(x, ((0, n_bg_p - n_bg), (0, 0)))
        wgt = jnp.pad(wgt, ((0, n_bg_p - n_bg), (0, 0)))
        Xb.append(x)
        Wb.append(wgt)
        Cb.append(_chunk_init(x, wgt, n_bg, CENTER))

    cents_fg = kmeans_batched(jnp.stack(Xf, 0), jnp.stack(Wf, 0),
                              jnp.stack(Cf, 0))              # (B*ways, K, C)
    cents_bg = kmeans_batched(jnp.stack(Xb, 0), jnp.stack(Wb, 0),
                              jnp.stack(Cb, 0))              # (B, K, C)

    # ---- prototypes: centroids + GLOBAL_CONST * masked global average -----
    fg_glo_m = jnp.mean(fg_glo, axis=1)                        # (Wa, B, C)
    bg_glo_m = jnp.mean(jnp.mean(bg_glo, axis=1), axis=0)      # (B, C)

    P_all = []
    for epi in range(B):
        protos = [cents_bg[epi] + GLOBAL_CONST * bg_glo_m[epi][None, :]]
        for way in range(n_ways):
            protos.append(cents_fg[epi * n_ways + way]
                          + GLOBAL_CONST * fg_glo_m[way, epi][None, :])
        p = jnp.concatenate(protos, 0)                          # (n_cls*K, C)
        P_all.append(jnp.pad(p, ((0, KP - p.shape[0]), (0, 0))))
    P_all = jnp.stack(P_all, 0)                                 # (B, KP, C) f32

    # ---- fused cos-dist + softmax + prototype selection + decoder ---------
    R = n_queries * fh * fw
    Q = qry_fts.transpose(1, 0, 2, 3, 4).reshape(B, R, HDIM)    # (B, R, C) bf16
    prob, sig = query_head(Q, P_all, n_cls)                     # (B,n_cls,R),(B,1,R)

    output = prob.reshape(B, n_cls, n_queries, fh, fw)
    output = output.transpose(0, 2, 1, 3, 4).reshape(
        B * n_queries, n_cls, fh, fw)
    sigmas = sig.reshape(B, 1, n_queries, fh, fw)[:, :, 0]      # query 0

    mh = bilinear_matrix(H, fh)
    mw = bilinear_matrix(W, fw)
    output = jnp.einsum("Hh,nchw,Ww->ncHW", mh, output, mw)
    sigmas = jnp.einsum("Hh,nchw,Ww->ncHW", mh, sigmas, mw)

    align_loss = jnp.zeros((1,), jnp.float32) / B   # reference forward: zeros(1)/B
    output_refine = None
    return output, output_refine, align_loss, sigmas


if __name__ == "__main__":
    key = jax.random.PRNGKey(0)
    k1, k2, k3 = jax.random.split(key, 3)
    B, H, W = 2, 16, 16

    supp_imgs = [[jax.random.normal(k1, (B, 3, H, W), jnp.float32)]]   # way x shot
    qry_imgs = [jax.random.normal(k2, (B, 3, H, W), jnp.float32)]      # N queries

    yy, xx = jnp.meshgrid(jnp.arange(H), jnp.arange(W), indexing="ij")
    m0 = ((yy < 8) & (xx < 8)).astype(jnp.float32)
    m1 = ((yy >= 8) & (xx >= 8)).astype(jnp.float32)
    fore = jnp.stack([m0, m1], axis=0)                                 # (B, H, W)
    fore_mask = [[fore]]
    back_mask = [[1.0 - fore]]

    w_patch = 0.05 * jax.random.normal(k3, (3 * PATCH * PATCH, HDIM),
                                       jnp.float32)

    output, output_refine, align_loss, sigmas = few_shot_seg_forward(
        supp_imgs, fore_mask, back_mask, qry_imgs, w_patch)
    jax.block_until_ready((output, align_loss, sigmas))

    assert output.shape == (2, 2, 16, 16)
    assert sigmas.shape == (2, 1, 16, 16)
    assert align_loss.shape == (1,)
    assert bool(jnp.all(jnp.isfinite(output)))
    assert bool(jnp.all(jnp.isfinite(sigmas)))
    print("KERNEL_OK")
</pallas_src>

<mosaic_0001>
module attributes {stable_mosaic.version = 11 : i64} {
  func.func @_patch_embed_kernel(%arg0: i32, %arg1: memref<64x128xbf16, #tpu.memory_space<vmem>>, %arg2: memref<128x128xbf16, #tpu.memory_space<vmem>>, %arg3: memref<64x128xbf16, #tpu.memory_space<vmem>>) attributes {dimension_semantics = [#tpu.dimension_semantics<parallel>], iteration_bounds = array<i64: 1>, scalar_prefetch = 0 : i64, scratch_operands = 0 : i64, tpu.core_type = #tpu.core_type<tc>, window_params = [{transform_indices = @transform_0, window_bounds = array<i64: 64, 128>}, {pipeline_mode = #tpu.pipeline_mode<synchronous>, transform_indices = @transform_1, window_bounds = array<i64: 128, 128>}, {transform_indices = @transform_2, window_bounds = array<i64: 64, 128>}]} {
    %c0 = arith.constant 0 : index
    %c0_0 = arith.constant 0 : index
    %0 = vector.load %arg1[%c0, %c0_0] : memref<64x128xbf16, #tpu.memory_space<vmem>>, vector<64x128xbf16>
    %c0_1 = arith.constant 0 : index
    %c0_2 = arith.constant 0 : index
    %1 = vector.load %arg2[%c0_1, %c0_2] : memref<128x128xbf16, #tpu.memory_space<vmem>>, vector<128x128xbf16>
    %cst = arith.constant dense<0.000000e+00> : vector<64x128xf32>
    %2 = tpu.matmul %0, %1, %cst {dimension_numbers = #tpu.dot_dimension_numbers<[1], [0], [0], [1], [0, 0, 1, 1], [], []>} : vector<64x128xbf16>, vector<128x128xbf16>, vector<64x128xf32> -> vector<64x128xf32>
    %cst_3 = arith.constant 0.000000e+00 : f32
    %3 = vector.broadcast %cst_3 : f32 to vector<64x128xf32>
    %4 = arith.maximumf %2, %3 : vector<64x128xf32>
    %5 = arith.truncf %4 : vector<64x128xf32> to vector<64x128xbf16>
    %c0_4 = arith.constant 0 : index
    %c0_5 = arith.constant 0 : index
    %6 = vector.load %arg3[%c0_4, %c0_5] : memref<64x128xbf16, #tpu.memory_space<vmem>>, vector<64x128xbf16>
    tpu.vector_store %arg3[%c0_4, %c0_5], %5 {strides = array<i32>} : memref<64x128xbf16, #tpu.memory_space<vmem>>, vector<64x128xbf16>,
    return
  }
  func.func @transform_0(%arg0: i32) -> (i32, i32) {
    %c0_i32 = arith.constant 0 : i32
    %c0_i32_0 = arith.constant 0 : i32
    return %arg0, %c0_i32 : i32, i32
  }
  func.func @transform_1(%arg0: i32) -> (i32, i32) {
    %c0_i32 = arith.constant 0 : i32
    %c0_i32_0 = arith.constant 0 : i32
    %c0_i32_1 = arith.constant 0 : i32
    return %c0_i32, %c0_i32_0 : i32, i32
  }
  func.func @transform_2(%arg0: i32) -> (i32, i32) {
    %c0_i32 = arith.constant 0 : i32
    %c0_i32_0 = arith.constant 0 : i32
    return %arg0, %c0_i32 : i32, i32
  }
}

</mosaic_0001>

<bundles_post_ra>
// kernel: tpu_custom_call.1
= control target key start
LH: loop header
LB: loop body
LE: loop exit
PB: predicated region body
PF: predicated region fallthrough
CT: control target
= control target key end

     0   :  { %7 = vsyncpa [#allocation3], 0  ;;  %s441_s0 = inlined_call_operand.hbm [shape: bf16[64,128], index: 0, kind: input, shape index: {}]   ;;  %s442_s1 = inlined_call_operand.hbm [shape: bf16[128,128], index: 1, kind: input, shape index: {}]   ;;  %s443_s2 = inlined_call_operand.hbm [shape: bf16[64,128], index: 2, kind: output, shape index: {}]  }
   0x1   :  { %8 = vsyncpa [#allocation6], 0 }
   0x2   :  { %9 = vsyncpa [#allocation4], 0  ;;  %s14_s11 = sshll.u32 %s441_s0, 4  ;;  %s403_s12 = smov [#allocation2]   ;;  %s15_s11 = int_to_ptr.hbm [resolvable:$true] %s14_s11 }
   0x3   :  { %s16_s13 = sshll.u32 %s403_s12, 4  ;;  %s27_s16 = sshll.u32 %s442_s1, 4  ;;  %s17_s13 = int_to_ptr.vmem [resolvable:$true] %s16_s13  ;;  %s28_s16 = int_to_ptr.hbm [resolvable:$true] %s27_s16 }
   0x4   :  { %s404_s17 = smov 64   ;;  %s405_s18 = smov 4  }
   0x5   :  { %22 = dma.hbm_to_vmem [thread:$0]  %s15_s11, 512, %s17_s13, [#allocation3], %s404_s17, %s404_s17, %s405_s18  }
   0x6   :  { %s406_s19 = smov [#allocation5]  }
   0x7   :  { %s29_s20 = sshll.u32 %s406_s19, 4  ;;  %s30_s20 = int_to_ptr.vmem [resolvable:$true] %s29_s20 }
   0x8   :  { %35 = dma.hbm_to_vmem [thread:$0]  %s28_s16, 1024, %s30_s20, [#allocation6], %s404_s17, %s404_s17, %s405_s18  }
   0x9   :  { %397 = dma.done.wait [#allocation3], 512  }
   0xa   :  { %398 = vsyncadd [#allocation3], 4294966784 }
   0xb   :  { %399 = dma.done.wait [#allocation6], 1024  }
   0xc   :  { %400 = vsyncadd [#allocation6], 4294966272  ;;  %v272_v0 = vld [vmem:[#allocation5 + $0x38] sm:$0xff]  ;;  %v271_v1 = vld [vmem:[#allocation5 + $0x30] sm:$0xff]  ;;  %s407_s0 = smov [#allocation7]   ;;  %s199_s23 = sshll.u32 %s443_s2, 4  ;;  %s200_s23 = int_to_ptr.hbm [resolvable:$true] %s199_s23 }
   0xd   :  { %140 = vmatpush.bf16.msra.mxu0 %v272_v0  ;;  %296 = vmatpush.bf16.msra.mxu1 %v272_v0  ;;  %v270_v2 = vld [vmem:[#allocation5 + $0x28] sm:$0xff]  ;;  %v269_v3 = vld [vmem:[#allocation5 + $0x20] sm:$0xff]  ;;  %v268_v4 = vld [vmem:[#allocation5 + $0x18] sm:$0xff]  ;;  %s197_s1 = sshll.u32 %s407_s0, 4  ;;  %s198_s1 = int_to_ptr.vmem [resolvable:$true] %s197_s1 }
   0xe   :  { %297 = vmatpush.bf16.msra.mxu2 %v272_v0  ;;  %298 = vmatpush.bf16.msra.mxu3 %v272_v0  ;;  %v267_v5 = vld [vmem:[#allocation5 + $0x10] sm:$0xff]  ;;  %v266_v6 = vld [vmem:[#allocation5 + $0x8] sm:$0xff]  ;;  %v265_v7 = vld [vmem:[#allocation5] sm:$0xff] }
   0xf   :  { %v261_v8 = vld [vmem:[#allocation2] sm:$0xff]  ;;  %v262_v9 = vld [vmem:[#allocation2 + $0x8] sm:$0xff]  ;;  %v263_v10 = vld [vmem:[#allocation2 + $0x10] sm:$0xff] }
  0x10   :  { %v264_v11 = vld [vmem:[#allocation2 + $0x18] sm:$0xff] }
  0x11   :  { %141 = vmatpush.bf16.msra.mxu0 %v271_v1  ;;  %299 = vmatpush.bf16.msra.mxu1 %v271_v1 }
  0x12   :  { %300 = vmatpush.bf16.msra.mxu2 %v271_v1  ;;  %301 = vmatpush.bf16.msra.mxu3 %v271_v1 }
  0x15   :  { %142 = vmatpush.bf16.msra.mxu0 %v270_v2  ;;  %302 = vmatpush.bf16.msra.mxu1 %v270_v2 }
  0x16   :  { %303 = vmatpush.bf16.msra.mxu2 %v270_v2  ;;  %304 = vmatpush.bf16.msra.mxu3 %v270_v2 }
  0x19   :  { %143 = vmatpush.bf16.msra.mxu0 %v269_v3  ;;  %305 = vmatpush.bf16.msra.mxu1 %v269_v3 }
  0x1a   :  { %306 = vmatpush.bf16.msra.mxu2 %v269_v3  ;;  %307 = vmatpush.bf16.msra.mxu3 %v269_v3 }
  0x1d   :  { %144 = vmatpush.bf16.msra.mxu0 %v268_v4  ;;  %308 = vmatpush.bf16.msra.mxu1 %v268_v4 }
  0x1e   :  { %309 = vmatpush.bf16.msra.mxu2 %v268_v4  ;;  %310 = vmatpush.bf16.msra.mxu3 %v268_v4 }
  0x21   :  { %145 = vmatpush.bf16.msra.mxu0 %v267_v5  ;;  %311 = vmatpush.bf16.msra.mxu1 %v267_v5 }
  0x22   :  { %312 = vmatpush.bf16.msra.mxu2 %v267_v5  ;;  %313 = vmatpush.bf16.msra.mxu3 %v267_v5 }
  0x25   :  { %146 = vmatpush.bf16.msra.mxu0 %v266_v6  ;;  %314 = vmatpush.bf16.msra.mxu1 %v266_v6 }
  0x26   :  { %315 = vmatpush.bf16.msra.mxu2 %v266_v6  ;;  %316 = vmatpush.bf16.msra.mxu3 %v266_v6 }
  0x29   :  { %147 = vmatpush.bf16.msra.mxu0 %v265_v7  ;;  %317 = vmatpush.bf16.msra.mxu1 %v265_v7 }
  0x2a   :  { %318 = vmatpush.bf16.msra.mxu2 %v265_v7  ;;  %319 = vmatpush.bf16.msra.mxu3 %v265_v7 }
  0x2c   :  { %148 = vmatmul.bf16.vlgmr.msra.gmra.mxu0 %v261_v8  ;;  %153 = vmatmul.bf16.vlgmr.msra.gmra.mxu1 %v262_v9 }
  0x2d   :  { %158 = vmatmul.bf16.vlgmr.msra.gmra.mxu2 %v263_v10  ;;  %163 = vmatmul.bf16.vlgmr.msra.gmra.mxu3 %v264_v11 }
  0xa9   :  { %v149_v12 = vpop.f32.mrf.mxu0  ;;  %v154_v13 = vpop.f32.mrf.mxu1 }
  0xaa   :  { %v169_v18 = vmax.f32 %v149_v12, 0.0  ;;  %v171_v19 = vmax.f32 %v154_v13, 0.0 }
  0xb0   :  { %v159_v14 = vpop.f32.mrf.mxu2  ;;  %v164_v15 = vpop.f32.mrf.mxu3 }
  0xb1   :  { %v151_v16 = vpop.f32.mrf.mxu0  ;;  %v156_v17 = vpop.f32.mrf.mxu1  ;;  %v173_v26 = vmax.f32 %v159_v14, 0.0  ;;  %v175_v27 = vmax.f32 %v164_v15, 0.0 }
  0xb2   :  { %v170_v20 = vmax.f32 %v151_v16, 0.0  ;;  %v172_v21 = vmax.f32 %v156_v17, 0.0 }
  0xb4   :  { %v276_v22 = vpack.c.bf16 %v170_v20, %v169_v18  ;;  %v281_v23 = vpack.c.bf16 %v172_v21, %v171_v19 }
  0xb6   :  { %277 = vst [vmem:[#allocation7] sm:$0xff] %v276_v22  }
  0xb7   :  { %293 = vst [vmem:[#allocation7 + $0x8] sm:$0xff] %v281_v23  }
  0xb8   :  { %v161_v24 = vpop.f32.mrf.mxu2  ;;  %v166_v25 = vpop.f32.mrf.mxu3 }
  0xb9   :  { %v174_v28 = vmax.f32 %v161_v24, 0.0  ;;  %v176_v29 = vmax.f32 %v166_v25, 0.0 }
  0xbb   :  { %v286_v30 = vpack.c.bf16 %v174_v28, %v173_v26  ;;  %v291_v31 = vpack.c.bf16 %v176_v29, %v175_v27 }
  0xbd   :  { %294 = vst [vmem:[#allocation7 + $0x10] sm:$0xff] %v286_v30  }
  0xbe   :  { %295 = vst [vmem:[#allocation7 + $0x18] sm:$0xff] %v291_v31  }
  0xbf   :  { %205 = dma.vmem_to_hbm [thread:$0]  %s198_s1, 512, %s200_s23, [#allocation4], %s404_s17, %s404_s17, %s405_s18  }
  0xc0   :  { %401 = dma.done.wait [#allocation4], 512  }
  0xc1   :  { %402 = vsyncadd [#allocation4], 4294966784 }
  0xc2   :  { %210 = vsyncpa [#allocation3], 1 }
  0xc3   :  { %211 = vsyncpa [#allocation6], 1 }
  0xc4   :  { %212 = vsyncpa [#allocation4], 1 }

</bundles_post_ra>
